<compile_context>
chip_gen: v5e
topology: v5e:2x2
jax: 0.10.0
libtpu: 0.0.40
codegen_flags: <defaults>
</compile_context>

<pallas_src>
import jax
import jax.numpy as jnp
from jax.experimental import pallas as pl
from jax.experimental.pallas import tpu as pltpu


# ----------------------------- Pallas kernels ------------------------------

def _make_row_kernel(add_residual: bool, fuse_1x1: bool):
    """One output row (Cout, W): 3x3 conv (+folded BN/bias) [+residual] + ReLU
    [+ fused 1x1 conv]."""

    def body(xt_ref, xm_ref, xb_ref, w_ref, b_ref, o_ref, conv3):
        co = w_ref.shape[1]
        w_out = o_ref.shape[-1]
        rows = (xt_ref[...], xm_ref[...], xb_ref[...])       # each (Cin, W+2) bf16
        acc = jnp.zeros((co, w_out), jnp.float32)
        for kh in range(3):
            for kw in range(3):
                acc = acc + jnp.dot(
                    w_ref[3 * kh + kw],                       # (Cout, Cin) bf16
                    rows[kh][:, kw:kw + w_out],               # (Cin,  W)   bf16
                    preferred_element_type=jnp.float32)
        acc = acc + b_ref[...]                                # bias (+ BN shift)
        if add_residual:
            # residual = centre row interior (same padded activation).
            acc = acc + rows[1][:, 1:1 + w_out].astype(jnp.float32)
        acc = jnp.maximum(acc, 0.0)                           # ReLU
        if conv3 is not None:
            w3_ref, b3_ref = conv3                            # fused 1x1 conv
            acc = jnp.dot(w3_ref[...], acc.astype(jnp.bfloat16),
                          preferred_element_type=jnp.float32) + b3_ref[...]
        o_ref[...] = acc.astype(o_ref.dtype)

    if fuse_1x1:
        def kernel(xt, xm, xb, w, b, w3, b3, o):
            body(xt, xm, xb, w, b, o, (w3, b3))
    else:
        def kernel(xt, xm, xb, w, b, o):
            body(xt, xm, xb, w, b, o, None)
    return kernel


def conv3x3_rows(xp, w, b, *, add_residual, w3=None, b3=None,
                 out_dtype=jnp.bfloat16):
    """3x3 conv (stride 1) over a spatially zero-padded activation.

    xp: (N, H+2, Cin, W+2) bf16;  w: (9, Cout, Cin) bf16 (BN pre-folded);
    b: (Cout, 1) f32.  Optional fused 1x1: w3 (Cout, Cout) bf16, b3 (Cout, 1).
    Returns (N, H, Cout, W) in out_dtype.
    """
    n, hp, ci, wp = xp.shape
    h, wout = hp - 2, wp - 2
    co = w.shape[1]
    fuse = w3 is not None

    def row_spec(kh):
        return pl.BlockSpec((None, None, ci, wp),
                            lambda ni, hi: (ni, hi + kh, 0, 0))

    in_specs = [row_spec(0), row_spec(1), row_spec(2),
                pl.BlockSpec((9, co, ci), lambda ni, hi: (0, 0, 0)),
                pl.BlockSpec((co, 1), lambda ni, hi: (0, 0))]
    args = [xp, xp, xp, w, b]
    if fuse:
        in_specs += [pl.BlockSpec((co, co), lambda ni, hi: (0, 0)),
                     pl.BlockSpec((co, 1), lambda ni, hi: (0, 0))]
        args += [w3, b3]

    flops = 2 * n * h * wout * co * (9 * ci + (co if fuse else 0))
    bytes_accessed = (3 * xp.size * xp.dtype.itemsize
                      + w.size * w.dtype.itemsize
                      + n * h * co * wout * jnp.dtype(out_dtype).itemsize)

    return pl.pallas_call(
        _make_row_kernel(add_residual, fuse),
        out_shape=jax.ShapeDtypeStruct((n, h, co, wout), out_dtype),
        grid=(n, h),
        in_specs=in_specs,
        out_specs=pl.BlockSpec((None, None, co, wout),
                               lambda ni, hi: (ni, hi, 0, 0)),
        compiler_params=pltpu.CompilerParams(
            dimension_semantics=("parallel", "parallel"),
            # Row-sized blocks are small; 32 MiB leaves ample headroom on
            # v5e/v6e (128 MiB) and fits v7x's 64 MiB VMEM.
            vmem_limit_bytes=32 * 1024 * 1024),
        cost_estimate=pl.CostEstimate(flops=int(flops), transcendentals=0,
                                      bytes_accessed=int(bytes_accessed)),
    )(*args)


# ------------------------------ JAX glue -----------------------------------

def _fold_3x3(w_hwio, b, scale=None, shift=None):
    """HWIO (3,3,Ci,Co) -> (9, Co, Ci) bf16 with BN scale folded in f32 first;
    bias -> (Co, 1) f32 (with BN shift folded)."""
    kh, kw, ci, co = w_hwio.shape
    w = jnp.transpose(w_hwio, (0, 1, 3, 2)).reshape(kh * kw, co, ci)
    if scale is not None:
        w = w * scale[None, :, None]
        b = b * scale + shift
    return w.astype(jnp.bfloat16), b.reshape(co, 1).astype(jnp.float32)


def _pad_hw(a):
    """(N, H, C, W) -> (N, H+2, C, W+2), zero padding the spatial dims."""
    return jnp.pad(a, ((0, 0), (1, 1), (0, 0), (1, 1)))


def final_conv_forward(x_nchw, params, residual=True, batch_norm=True):
    """Pallas implementation of FinalConv.forward.  x_nchw: (N, Cin, H, W)."""
    eps = 1e-5
    cout = params["conv1_w"].shape[-1]
    blocks = params["blocks"]

    # conv3 (1x1) weights, fused into the last pallas_call's epilogue.
    w3 = params["conv3_w"][0, 0].T.astype(jnp.bfloat16)          # (Co, Ci)
    b3 = params["conv3_b"].reshape(cout, 1).astype(jnp.float32)

    # NCHW -> (N, H, C, W): spatial W on the lanes, channels kept unpadded.
    x = jnp.transpose(x_nchw, (0, 2, 1, 3)).astype(jnp.bfloat16)

    # x1 = relu(conv1(x)).  PyTorch raises for blocks < 2 (conv3(None)); if the
    # block list is empty we apply conv3 to x1 instead (fused here).
    w1, b1 = _fold_3x3(params["conv1_w"], params["conv1_b"])
    fuse_now = len(blocks) == 0
    out = conv3x3_rows(_pad_hw(x), w1, b1, add_residual=False,
                       w3=w3 if fuse_now else None,
                       b3=b3 if fuse_now else None,
                       out_dtype=jnp.float32 if fuse_now else jnp.bfloat16)

    for i, blk in enumerate(blocks):
        if batch_norm:
            scale = blk["gamma"] / jnp.sqrt(blk["var"] + eps)
            shift = blk["beta"] - blk["mean"] * scale
        else:
            scale = shift = None
        wk, bk = _fold_3x3(blk["w"], blk["b"], scale, shift)
        is_last = i == len(blocks) - 1
        out = conv3x3_rows(_pad_hw(out), wk, bk, add_residual=residual,
                           w3=w3 if is_last else None,
                           b3=b3 if is_last else None,
                           out_dtype=jnp.float32 if is_last else jnp.bfloat16)

    return jnp.transpose(out, (0, 2, 1, 3))                      # back to NCHW


# --------------------- deterministic parameter init ------------------------

def init_params(key, cin, cout, blocks):
    nk = 4 + 6 * max(blocks - 1, 0)
    ks = iter(jax.random.split(key, nk))
    p = {}
    p["conv1_w"] = 0.2 * jax.random.normal(next(ks), (3, 3, cin, cout), jnp.float32)
    p["conv1_b"] = 0.1 * jax.random.normal(next(ks), (cout,), jnp.float32)
    blks = []
    for _ in range(blocks - 1):
        blks.append({
            "w": 0.2 * jax.random.normal(next(ks), (3, 3, cout, cout), jnp.float32),
            "b": 0.1 * jax.random.normal(next(ks), (cout,), jnp.float32),
            "gamma": 1.0 + 0.1 * jax.random.normal(next(ks), (cout,), jnp.float32),
            "beta": 0.1 * jax.random.normal(next(ks), (cout,), jnp.float32),
            "mean": 0.1 * jax.random.normal(next(ks), (cout,), jnp.float32),
            "var": 1.0 + 0.1 * jax.random.uniform(next(ks), (cout,), jnp.float32),
        })
    p["blocks"] = blks
    p["conv3_w"] = 0.2 * jax.random.normal(next(ks), (1, 1, cout, cout), jnp.float32)
    p["conv3_b"] = 0.1 * jax.random.normal(next(ks), (cout,), jnp.float32)
    return p


# ----------------------- plain-JAX reference (check) -----------------------

def reference_forward(x_nchw, params, residual=True, batch_norm=True):
    eps = 1e-5

    def conv(x, w, b):
        y = jax.lax.conv_general_dilated(
            x, w, (1, 1), "SAME",
            dimension_numbers=("NCHW", "HWIO", "NCHW"),
            precision=jax.lax.Precision.HIGHEST)
        return y + b[None, :, None, None]

    x1 = jax.nn.relu(conv(x_nchw, params["conv1_w"], params["conv1_b"]))
    x2 = x1
    for blk in params["blocks"]:
        x2 = conv(x1, blk["w"], blk["b"])
        if batch_norm:
            inv = (1.0 / jnp.sqrt(blk["var"] + eps))[None, :, None, None]
            x2 = (x2 - blk["mean"][None, :, None, None]) * inv \
                 * blk["gamma"][None, :, None, None] + blk["beta"][None, :, None, None]
        if residual:
            x2 = x2 + x1
        x2 = jax.nn.relu(x2)
        x1 = x2
    return conv(x2, params["conv3_w"], params["conv3_b"])


# --------------------------------- main -------------------------------------

if __name__ == "__main__":
    key = jax.random.PRNGKey(0)
    kx, kp = jax.random.split(key)

    N, Cin, Cout, H, W, blocks = 2, 4, 8, 16, 16, 2
    x_nchw = jax.random.normal(kx, (N, Cin, H, W), jnp.float32)
    params = init_params(kp, Cin, Cout, blocks)

    fwd = jax.jit(lambda x, p: final_conv_forward(x, p, residual=True, batch_norm=True))
    out = jax.block_until_ready(fwd(x_nchw, params))

    ref = reference_forward(x_nchw, params, residual=True, batch_norm=True)
    assert out.shape == ref.shape, (out.shape, ref.shape)
    # bf16 activation/weight storage with f32 accumulation vs. f32 reference.
    if not jnp.allclose(out, ref, atol=5e-2, rtol=5e-2):
        max_err = float(jnp.max(jnp.abs(out - ref)))
        raise AssertionError(f"Pallas output mismatch vs reference, max_err={max_err}")

    print("KERNEL_OK")
</pallas_src>

<mosaic_0001>
module attributes {stable_mosaic.version = 11 : i64} {
  func.func @kernel(%arg0: i32, %arg1: i32, %arg2: memref<1x1x4x18xbf16, #tpu.memory_space<vmem>>, %arg3: memref<1x1x4x18xbf16, #tpu.memory_space<vmem>>, %arg4: memref<1x1x4x18xbf16, #tpu.memory_space<vmem>>, %arg5: memref<9x8x4xbf16, #tpu.memory_space<vmem>>, %arg6: memref<8x1xf32, #tpu.memory_space<vmem>>, %arg7: memref<1x1x8x16xbf16, #tpu.memory_space<vmem>>) attributes {dimension_semantics = [#tpu.dimension_semantics<parallel>, #tpu.dimension_semantics<parallel>], iteration_bounds = array<i64: 2, 16>, scalar_prefetch = 0 : i64, scratch_operands = 0 : i64, tpu.core_type = #tpu.core_type<tc>, window_params = [{transform_indices = @transform_0, window_bounds = array<i64: 1, 1, 4, 18>}, {transform_indices = @transform_1, window_bounds = array<i64: 1, 1, 4, 18>}, {transform_indices = @transform_2, window_bounds = array<i64: 1, 1, 4, 18>}, {pipeline_mode = #tpu.pipeline_mode<synchronous>, transform_indices = @transform_3, window_bounds = array<i64: 9, 8, 4>}, {pipeline_mode = #tpu.pipeline_mode<synchronous>, transform_indices = @transform_4, window_bounds = array<i64: 8, 1>}, {transform_indices = @transform_5, window_bounds = array<i64: 1, 1, 8, 16>}]} {
    %c0 = arith.constant 0 : index
    %c0_0 = arith.constant 0 : index
    %c0_1 = arith.constant 0 : index
    %c0_2 = arith.constant 0 : index
    %0 = vector.load %arg2[%c0, %c0_0, %c0_1, %c0_2] : memref<1x1x4x18xbf16, #tpu.memory_space<vmem>>, vector<1x1x4x18xbf16>
    %1 = vector.shape_cast %0 : vector<1x1x4x18xbf16> to vector<4x18xbf16>
    %c0_3 = arith.constant 0 : index
    %c0_4 = arith.constant 0 : index
    %c0_5 = arith.constant 0 : index
    %c0_6 = arith.constant 0 : index
    %2 = vector.load %arg3[%c0_3, %c0_4, %c0_5, %c0_6] : memref<1x1x4x18xbf16, #tpu.memory_space<vmem>>, vector<1x1x4x18xbf16>
    %3 = vector.shape_cast %2 : vector<1x1x4x18xbf16> to vector<4x18xbf16>
    %c0_7 = arith.constant 0 : index
    %c0_8 = arith.constant 0 : index
    %c0_9 = arith.constant 0 : index
    %c0_10 = arith.constant 0 : index
    %4 = vector.load %arg4[%c0_7, %c0_8, %c0_9, %c0_10] : memref<1x1x4x18xbf16, #tpu.memory_space<vmem>>, vector<1x1x4x18xbf16>
    %5 = vector.shape_cast %4 : vector<1x1x4x18xbf16> to vector<4x18xbf16>
    %cst = arith.constant 0.000000e+00 : f32
    %6 = vector.broadcast %cst : f32 to vector<8x16xf32>
    %c0_11 = arith.constant 0 : index
    %c0_12 = arith.constant 0 : index
    %c0_13 = arith.constant 0 : index
    %7 = vector.load %arg5[%c0_11, %c0_12, %c0_13] : memref<9x8x4xbf16, #tpu.memory_space<vmem>>, vector<1x8x4xbf16>
    %8 = vector.shape_cast %7 : vector<1x8x4xbf16> to vector<8x4xbf16>
    %9 = vector.extract_strided_slice %1 {offsets = [0, 0], sizes = [4, 16], strides = [1, 1]} : vector<4x18xbf16> to vector<4x16xbf16>
    %cst_14 = arith.constant dense<0.000000e+00> : vector<8x16xf32>
    %10 = tpu.matmul %8, %9, %cst_14 {dimension_numbers = #tpu.dot_dimension_numbers<[1], [0], [0], [1], [0, 0, 1, 1], [], []>} : vector<8x4xbf16>, vector<4x16xbf16>, vector<8x16xf32> -> vector<8x16xf32>
    %11 = arith.addf %6, %10 : vector<8x16xf32>
    %c1 = arith.constant 1 : index
    %c0_15 = arith.constant 0 : index
    %c0_16 = arith.constant 0 : index
    %12 = vector.load %arg5[%c1, %c0_15, %c0_16] : memref<9x8x4xbf16, #tpu.memory_space<vmem>>, vector<1x8x4xbf16>
    %13 = vector.shape_cast %12 : vector<1x8x4xbf16> to vector<8x4xbf16>
    %14 = vector.extract_strided_slice %1 {offsets = [0, 1], sizes = [4, 16], strides = [1, 1]} : vector<4x18xbf16> to vector<4x16xbf16>
    %cst_17 = arith.constant dense<0.000000e+00> : vector<8x16xf32>
    %15 = tpu.matmul %13, %14, %cst_17 {dimension_numbers = #tpu.dot_dimension_numbers<[1], [0], [0], [1], [0, 0, 1, 1], [], []>} : vector<8x4xbf16>, vector<4x16xbf16>, vector<8x16xf32> -> vector<8x16xf32>
    %16 = arith.addf %11, %15 : vector<8x16xf32>
    %c2 = arith.constant 2 : index
    %c0_18 = arith.constant 0 : index
    %c0_19 = arith.constant 0 : index
    %17 = vector.load %arg5[%c2, %c0_18, %c0_19] : memref<9x8x4xbf16, #tpu.memory_space<vmem>>, vector<1x8x4xbf16>
    %18 = vector.shape_cast %17 : vector<1x8x4xbf16> to vector<8x4xbf16>
    %19 = vector.extract_strided_slice %1 {offsets = [0, 2], sizes = [4, 16], strides = [1, 1]} : vector<4x18xbf16> to vector<4x16xbf16>
    %cst_20 = arith.constant dense<0.000000e+00> : vector<8x16xf32>
    %20 = tpu.matmul %18, %19, %cst_20 {dimension_numbers = #tpu.dot_dimension_numbers<[1], [0], [0], [1], [0, 0, 1, 1], [], []>} : vector<8x4xbf16>, vector<4x16xbf16>, vector<8x16xf32> -> vector<8x16xf32>
    %21 = arith.addf %16, %20 : vector<8x16xf32>
    %c3 = arith.constant 3 : index
    %c0_21 = arith.constant 0 : index
    %c0_22 = arith.constant 0 : index
    %22 = vector.load %arg5[%c3, %c0_21, %c0_22] : memref<9x8x4xbf16, #tpu.memory_space<vmem>>, vector<1x8x4xbf16>
    %23 = vector.shape_cast %22 : vector<1x8x4xbf16> to vector<8x4xbf16>
    %24 = vector.extract_strided_slice %3 {offsets = [0, 0], sizes = [4, 16], strides = [1, 1]} : vector<4x18xbf16> to vector<4x16xbf16>
    %cst_23 = arith.constant dense<0.000000e+00> : vector<8x16xf32>
    %25 = tpu.matmul %23, %24, %cst_23 {dimension_numbers = #tpu.dot_dimension_numbers<[1], [0], [0], [1], [0, 0, 1, 1], [], []>} : vector<8x4xbf16>, vector<4x16xbf16>, vector<8x16xf32> -> vector<8x16xf32>
    %26 = arith.addf %21, %25 : vector<8x16xf32>
    %c4 = arith.constant 4 : index
    %c0_24 = arith.constant 0 : index
    %c0_25 = arith.constant 0 : index
    %27 = vector.load %arg5[%c4, %c0_24, %c0_25] : memref<9x8x4xbf16, #tpu.memory_space<vmem>>, vector<1x8x4xbf16>
    %28 = vector.shape_cast %27 : vector<1x8x4xbf16> to vector<8x4xbf16>
    %29 = vector.extract_strided_slice %3 {offsets = [0, 1], sizes = [4, 16], strides = [1, 1]} : vector<4x18xbf16> to vector<4x16xbf16>
    %cst_26 = arith.constant dense<0.000000e+00> : vector<8x16xf32>
    %30 = tpu.matmul %28, %29, %cst_26 {dimension_numbers = #tpu.dot_dimension_numbers<[1], [0], [0], [1], [0, 0, 1, 1], [], []>} : vector<8x4xbf16>, vector<4x16xbf16>, vector<8x16xf32> -> vector<8x16xf32>
    %31 = arith.addf %26, %30 : vector<8x16xf32>
    %c5 = arith.constant 5 : index
    %c0_27 = arith.constant 0 : index
    %c0_28 = arith.constant 0 : index
    %32 = vector.load %arg5[%c5, %c0_27, %c0_28] : memref<9x8x4xbf16, #tpu.memory_space<vmem>>, vector<1x8x4xbf16>
    %33 = vector.shape_cast %32 : vector<1x8x4xbf16> to vector<8x4xbf16>
    %34 = vector.extract_strided_slice %3 {offsets = [0, 2], sizes = [4, 16], strides = [1, 1]} : vector<4x18xbf16> to vector<4x16xbf16>
    %cst_29 = arith.constant dense<0.000000e+00> : vector<8x16xf32>
    %35 = tpu.matmul %33, %34, %cst_29 {dimension_numbers = #tpu.dot_dimension_numbers<[1], [0], [0], [1], [0, 0, 1, 1], [], []>} : vector<8x4xbf16>, vector<4x16xbf16>, vector<8x16xf32> -> vector<8x16xf32>
    %36 = arith.addf %31, %35 : vector<8x16xf32>
    %c6 = arith.constant 6 : index
    %c0_30 = arith.constant 0 : index
    %c0_31 = arith.constant 0 : index
    %37 = vector.load %arg5[%c6, %c0_30, %c0_31] : memref<9x8x4xbf16, #tpu.memory_space<vmem>>, vector<1x8x4xbf16>
    %38 = vector.shape_cast %37 : vector<1x8x4xbf16> to vector<8x4xbf16>
    %39 = vector.extract_strided_slice %5 {offsets = [0, 0], sizes = [4, 16], strides = [1, 1]} : vector<4x18xbf16> to vector<4x16xbf16>
    %cst_32 = arith.constant dense<0.000000e+00> : vector<8x16xf32>
    %40 = tpu.matmul %38, %39, %cst_32 {dimension_numbers = #tpu.dot_dimension_numbers<[1], [0], [0], [1], [0, 0, 1, 1], [], []>} : vector<8x4xbf16>, vector<4x16xbf16>, vector<8x16xf32> -> vector<8x16xf32>
    %41 = arith.addf %36, %40 : vector<8x16xf32>
    %c7 = arith.constant 7 : index
    %c0_33 = arith.constant 0 : index
    %c0_34 = arith.constant 0 : index
    %42 = vector.load %arg5[%c7, %c0_33, %c0_34] : memref<9x8x4xbf16, #tpu.memory_space<vmem>>, vector<1x8x4xbf16>
    %43 = vector.shape_cast %42 : vector<1x8x4xbf16> to vector<8x4xbf16>
    %44 = vector.extract_strided_slice %5 {offsets = [0, 1], sizes = [4, 16], strides = [1, 1]} : vector<4x18xbf16> to vector<4x16xbf16>
    %cst_35 = arith.constant dense<0.000000e+00> : vector<8x16xf32>
    %45 = tpu.matmul %43, %44, %cst_35 {dimension_numbers = #tpu.dot_dimension_numbers<[1], [0], [0], [1], [0, 0, 1, 1], [], []>} : vector<8x4xbf16>, vector<4x16xbf16>, vector<8x16xf32> -> vector<8x16xf32>
    %46 = arith.addf %41, %45 : vector<8x16xf32>
    %c8 = arith.constant 8 : index
    %c0_36 = arith.constant 0 : index
    %c0_37 = arith.constant 0 : index
    %47 = vector.load %arg5[%c8, %c0_36, %c0_37] : memref<9x8x4xbf16, #tpu.memory_space<vmem>>, vector<1x8x4xbf16>
    %48 = vector.shape_cast %47 : vector<1x8x4xbf16> to vector<8x4xbf16>
    %49 = vector.extract_strided_slice %5 {offsets = [0, 2], sizes = [4, 16], strides = [1, 1]} : vector<4x18xbf16> to vector<4x16xbf16>
    %cst_38 = arith.constant dense<0.000000e+00> : vector<8x16xf32>
    %50 = tpu.matmul %48, %49, %cst_38 {dimension_numbers = #tpu.dot_dimension_numbers<[1], [0], [0], [1], [0, 0, 1, 1], [], []>} : vector<8x4xbf16>, vector<4x16xbf16>, vector<8x16xf32> -> vector<8x16xf32>
    %51 = arith.addf %46, %50 : vector<8x16xf32>
    %c0_39 = arith.constant 0 : index
    %c0_40 = arith.constant 0 : index
    %52 = vector.load %arg6[%c0_39, %c0_40] : memref<8x1xf32, #tpu.memory_space<vmem>>, vector<8x1xf32>
    %53 = vector.broadcast %52 : vector<8x1xf32> to vector<8x16xf32>
    %54 = arith.addf %51, %53 : vector<8x16xf32>
    %cst_41 = arith.constant 0.000000e+00 : f32
    %55 = vector.broadcast %cst_41 : f32 to vector<8x16xf32>
    %56 = arith.maximumf %54, %55 : vector<8x16xf32>
    %57 = arith.truncf %56 : vector<8x16xf32> to vector<8x16xbf16>
    %c0_42 = arith.constant 0 : index
    %c0_43 = arith.constant 0 : index
    %c0_44 = arith.constant 0 : index
    %c0_45 = arith.constant 0 : index
    %58 = vector.load %arg7[%c0_42, %c0_43, %c0_44, %c0_45] : memref<1x1x8x16xbf16, #tpu.memory_space<vmem>>, vector<1x1x8x16xbf16>
    %59 = vector.shape_cast %58 : vector<1x1x8x16xbf16> to vector<8x16xbf16>
    %60 = vector.shape_cast %57 : vector<8x16xbf16> to vector<1x1x8x16xbf16>
    tpu.vector_store %arg7[%c0_42, %c0_43, %c0_44, %c0_45], %60 {strides = array<i32>} : memref<1x1x8x16xbf16, #tpu.memory_space<vmem>>, vector<1x1x8x16xbf16>,
    return
  }
  func.func @transform_0(%arg0: i32, %arg1: i32) -> (i32, i32, i32, i32) {
    %c0_i32 = arith.constant 0 : i32
    %0 = arith.addi %arg1, %c0_i32 : i32
    %c0_i32_0 = arith.constant 0 : i32
    %c0_i32_1 = arith.constant 0 : i32
    %c0_i32_2 = arith.constant 0 : i32
    return %arg0, %0, %c0_i32_0, %c0_i32_1 : i32, i32, i32, i32
  }
  func.func @transform_1(%arg0: i32, %arg1: i32) -> (i32, i32, i32, i32) {
    %c1_i32 = arith.constant 1 : i32
    %0 = arith.addi %arg1, %c1_i32 : i32
    %c0_i32 = arith.constant 0 : i32
    %c0_i32_0 = arith.constant 0 : i32
    %c0_i32_1 = arith.constant 0 : i32
    return %arg0, %0, %c0_i32, %c0_i32_0 : i32, i32, i32, i32
  }
  func.func @transform_2(%arg0: i32, %arg1: i32) -> (i32, i32, i32, i32) {
    %c2_i32 = arith.constant 2 : i32
    %0 = arith.addi %arg1, %c2_i32 : i32
    %c0_i32 = arith.constant 0 : i32
    %c0_i32_0 = arith.constant 0 : i32
    %c0_i32_1 = arith.constant 0 : i32
    return %arg0, %0, %c0_i32, %c0_i32_0 : i32, i32, i32, i32
  }
  func.func @transform_3(%arg0: i32, %arg1: i32) -> (i32, i32, i32) {
    %c0_i32 = arith.constant 0 : i32
    %c0_i32_0 = arith.constant 0 : i32
    %c0_i32_1 = arith.constant 0 : i32
    %c0_i32_2 = arith.constant 0 : i32
    return %c0_i32, %c0_i32_0, %c0_i32_1 : i32, i32, i32
  }
  func.func @transform_4(%arg0: i32, %arg1: i32) -> (i32, i32) {
    %c0_i32 = arith.constant 0 : i32
    %c0_i32_0 = arith.constant 0 : i32
    %c0_i32_1 = arith.constant 0 : i32
    return %c0_i32, %c0_i32_0 : i32, i32
  }
  func.func @transform_5(%arg0: i32, %arg1: i32) -> (i32, i32, i32, i32) {
    %c0_i32 = arith.constant 0 : i32
    %c0_i32_0 = arith.constant 0 : i32
    %c0_i32_1 = arith.constant 0 : i32
    return %arg0, %arg1, %c0_i32, %c0_i32_0 : i32, i32, i32, i32
  }
}

module attributes {stable_mosaic.version = 11 : i64} {
  func.func @kernel(%arg0: i32, %arg1: i32, %arg2: memref<1x1x8x18xbf16, #tpu.memory_space<vmem>>, %arg3: memref<1x1x8x18xbf16, #tpu.memory_space<vmem>>, %arg4: memref<1x1x8x18xbf16, #tpu.memory_space<vmem>>, %arg5: memref<9x8x8xbf16, #tpu.memory_space<vmem>>, %arg6: memref<8x1xf32, #tpu.memory_space<vmem>>, %arg7: memref<8x8xbf16, #tpu.memory_space<vmem>>, %arg8: memref<8x1xf32, #tpu.memory_space<vmem>>, %arg9: memref<1x1x8x16xf32, #tpu.memory_space<vmem>>) attributes {dimension_semantics = [#tpu.dimension_semantics<parallel>, #tpu.dimension_semantics<parallel>], iteration_bounds = array<i64: 2, 16>, scalar_prefetch = 0 : i64, scratch_operands = 0 : i64, tpu.core_type = #tpu.core_type<tc>, window_params = [{transform_indices = @transform_0, window_bounds = array<i64: 1, 1, 8, 18>}, {transform_indices = @transform_1, window_bounds = array<i64: 1, 1, 8, 18>}, {transform_indices = @transform_2, window_bounds = array<i64: 1, 1, 8, 18>}, {pipeline_mode = #tpu.pipeline_mode<synchronous>, transform_indices = @transform_3, window_bounds = array<i64: 9, 8, 8>}, {pipeline_mode = #tpu.pipeline_mode<synchronous>, transform_indices = @transform_4, window_bounds = array<i64: 8, 1>}, {pipeline_mode = #tpu.pipeline_mode<synchronous>, transform_indices = @transform_5, window_bounds = array<i64: 8, 8>}, {pipeline_mode = #tpu.pipeline_mode<synchronous>, transform_indices = @transform_6, window_bounds = array<i64: 8, 1>}, {transform_indices = @transform_7, window_bounds = array<i64: 1, 1, 8, 16>}]} {
    %c0 = arith.constant 0 : index
    %c0_0 = arith.constant 0 : index
    %c0_1 = arith.constant 0 : index
    %c0_2 = arith.constant 0 : index
    %0 = vector.load %arg2[%c0, %c0_0, %c0_1, %c0_2] : memref<1x1x8x18xbf16, #tpu.memory_space<vmem>>, vector<1x1x8x18xbf16>
    %1 = vector.shape_cast %0 : vector<1x1x8x18xbf16> to vector<8x18xbf16>
    %c0_3 = arith.constant 0 : index
    %c0_4 = arith.constant 0 : index
    %c0_5 = arith.constant 0 : index
    %c0_6 = arith.constant 0 : index
    %2 = vector.load %arg3[%c0_3, %c0_4, %c0_5, %c0_6] : memref<1x1x8x18xbf16, #tpu.memory_space<vmem>>, vector<1x1x8x18xbf16>
    %3 = vector.shape_cast %2 : vector<1x1x8x18xbf16> to vector<8x18xbf16>
    %c0_7 = arith.constant 0 : index
    %c0_8 = arith.constant 0 : index
    %c0_9 = arith.constant 0 : index
    %c0_10 = arith.constant 0 : index
    %4 = vector.load %arg4[%c0_7, %c0_8, %c0_9, %c0_10] : memref<1x1x8x18xbf16, #tpu.memory_space<vmem>>, vector<1x1x8x18xbf16>
    %5 = vector.shape_cast %4 : vector<1x1x8x18xbf16> to vector<8x18xbf16>
    %cst = arith.constant 0.000000e+00 : f32
    %6 = vector.broadcast %cst : f32 to vector<8x16xf32>
    %c0_11 = arith.constant 0 : index
    %c0_12 = arith.constant 0 : index
    %c0_13 = arith.constant 0 : index
    %7 = vector.load %arg5[%c0_11, %c0_12, %c0_13] : memref<9x8x8xbf16, #tpu.memory_space<vmem>>, vector<1x8x8xbf16>
    %8 = vector.shape_cast %7 : vector<1x8x8xbf16> to vector<8x8xbf16>
    %9 = vector.extract_strided_slice %1 {offsets = [0, 0], sizes = [8, 16], strides = [1, 1]} : vector<8x18xbf16> to vector<8x16xbf16>
    %cst_14 = arith.constant dense<0.000000e+00> : vector<8x16xf32>
    %10 = tpu.matmul %8, %9, %cst_14 {dimension_numbers = #tpu.dot_dimension_numbers<[1], [0], [0], [1], [0, 0, 1, 1], [], []>} : vector<8x8xbf16>, vector<8x16xbf16>, vector<8x16xf32> -> vector<8x16xf32>
    %11 = arith.addf %6, %10 : vector<8x16xf32>
    %c1 = arith.constant 1 : index
    %c0_15 = arith.constant 0 : index
    %c0_16 = arith.constant 0 : index
    %12 = vector.load %arg5[%c1, %c0_15, %c0_16] : memref<9x8x8xbf16, #tpu.memory_space<vmem>>, vector<1x8x8xbf16>
    %13 = vector.shape_cast %12 : vector<1x8x8xbf16> to vector<8x8xbf16>
    %14 = vector.extract_strided_slice %1 {offsets = [0, 1], sizes = [8, 16], strides = [1, 1]} : vector<8x18xbf16> to vector<8x16xbf16>
    %cst_17 = arith.constant dense<0.000000e+00> : vector<8x16xf32>
    %15 = tpu.matmul %13, %14, %cst_17 {dimension_numbers = #tpu.dot_dimension_numbers<[1], [0], [0], [1], [0, 0, 1, 1], [], []>} : vector<8x8xbf16>, vector<8x16xbf16>, vector<8x16xf32> -> vector<8x16xf32>
    %16 = arith.addf %11, %15 : vector<8x16xf32>
    %c2 = arith.constant 2 : index
    %c0_18 = arith.constant 0 : index
    %c0_19 = arith.constant 0 : index
    %17 = vector.load %arg5[%c2, %c0_18, %c0_19] : memref<9x8x8xbf16, #tpu.memory_space<vmem>>, vector<1x8x8xbf16>
    %18 = vector.shape_cast %17 : vector<1x8x8xbf16> to vector<8x8xbf16>
    %19 = vector.extract_strided_slice %1 {offsets = [0, 2], sizes = [8, 16], strides = [1, 1]} : vector<8x18xbf16> to vector<8x16xbf16>
    %cst_20 = arith.constant dense<0.000000e+00> : vector<8x16xf32>
    %20 = tpu.matmul %18, %19, %cst_20 {dimension_numbers = #tpu.dot_dimension_numbers<[1], [0], [0], [1], [0, 0, 1, 1], [], []>} : vector<8x8xbf16>, vector<8x16xbf16>, vector<8x16xf32> -> vector<8x16xf32>
    %21 = arith.addf %16, %20 : vector<8x16xf32>
    %c3 = arith.constant 3 : index
    %c0_21 = arith.constant 0 : index
    %c0_22 = arith.constant 0 : index
    %22 = vector.load %arg5[%c3, %c0_21, %c0_22] : memref<9x8x8xbf16, #tpu.memory_space<vmem>>, vector<1x8x8xbf16>
    %23 = vector.shape_cast %22 : vector<1x8x8xbf16> to vector<8x8xbf16>
    %24 = vector.extract_strided_slice %3 {offsets = [0, 0], sizes = [8, 16], strides = [1, 1]} : vector<8x18xbf16> to vector<8x16xbf16>
    %cst_23 = arith.constant dense<0.000000e+00> : vector<8x16xf32>
    %25 = tpu.matmul %23, %24, %cst_23 {dimension_numbers = #tpu.dot_dimension_numbers<[1], [0], [0], [1], [0, 0, 1, 1], [], []>} : vector<8x8xbf16>, vector<8x16xbf16>, vector<8x16xf32> -> vector<8x16xf32>
    %26 = arith.addf %21, %25 : vector<8x16xf32>
    %c4 = arith.constant 4 : index
    %c0_24 = arith.constant 0 : index
    %c0_25 = arith.constant 0 : index
    %27 = vector.load %arg5[%c4, %c0_24, %c0_25] : memref<9x8x8xbf16, #tpu.memory_space<vmem>>, vector<1x8x8xbf16>
    %28 = vector.shape_cast %27 : vector<1x8x8xbf16> to vector<8x8xbf16>
    %29 = vector.extract_strided_slice %3 {offsets = [0, 1], sizes = [8, 16], strides = [1, 1]} : vector<8x18xbf16> to vector<8x16xbf16>
    %cst_26 = arith.constant dense<0.000000e+00> : vector<8x16xf32>
    %30 = tpu.matmul %28, %29, %cst_26 {dimension_numbers = #tpu.dot_dimension_numbers<[1], [0], [0], [1], [0, 0, 1, 1], [], []>} : vector<8x8xbf16>, vector<8x16xbf16>, vector<8x16xf32> -> vector<8x16xf32>
    %31 = arith.addf %26, %30 : vector<8x16xf32>
    %c5 = arith.constant 5 : index
    %c0_27 = arith.constant 0 : index
    %c0_28 = arith.constant 0 : index
    %32 = vector.load %arg5[%c5, %c0_27, %c0_28] : memref<9x8x8xbf16, #tpu.memory_space<vmem>>, vector<1x8x8xbf16>
    %33 = vector.shape_cast %32 : vector<1x8x8xbf16> to vector<8x8xbf16>
    %34 = vector.extract_strided_slice %3 {offsets = [0, 2], sizes = [8, 16], strides = [1, 1]} : vector<8x18xbf16> to vector<8x16xbf16>
    %cst_29 = arith.constant dense<0.000000e+00> : vector<8x16xf32>
    %35 = tpu.matmul %33, %34, %cst_29 {dimension_numbers = #tpu.dot_dimension_numbers<[1], [0], [0], [1], [0, 0, 1, 1], [], []>} : vector<8x8xbf16>, vector<8x16xbf16>, vector<8x16xf32> -> vector<8x16xf32>
    %36 = arith.addf %31, %35 : vector<8x16xf32>
    %c6 = arith.constant 6 : index
    %c0_30 = arith.constant 0 : index
    %c0_31 = arith.constant 0 : index
    %37 = vector.load %arg5[%c6, %c0_30, %c0_31] : memref<9x8x8xbf16, #tpu.memory_space<vmem>>, vector<1x8x8xbf16>
    %38 = vector.shape_cast %37 : vector<1x8x8xbf16> to vector<8x8xbf16>
    %39 = vector.extract_strided_slice %5 {offsets = [0, 0], sizes = [8, 16], strides = [1, 1]} : vector<8x18xbf16> to vector<8x16xbf16>
    %cst_32 = arith.constant dense<0.000000e+00> : vector<8x16xf32>
    %40 = tpu.matmul %38, %39, %cst_32 {dimension_numbers = #tpu.dot_dimension_numbers<[1], [0], [0], [1], [0, 0, 1, 1], [], []>} : vector<8x8xbf16>, vector<8x16xbf16>, vector<8x16xf32> -> vector<8x16xf32>
    %41 = arith.addf %36, %40 : vector<8x16xf32>
    %c7 = arith.constant 7 : index
    %c0_33 = arith.constant 0 : index
    %c0_34 = arith.constant 0 : index
    %42 = vector.load %arg5[%c7, %c0_33, %c0_34] : memref<9x8x8xbf16, #tpu.memory_space<vmem>>, vector<1x8x8xbf16>
    %43 = vector.shape_cast %42 : vector<1x8x8xbf16> to vector<8x8xbf16>
    %44 = vector.extract_strided_slice %5 {offsets = [0, 1], sizes = [8, 16], strides = [1, 1]} : vector<8x18xbf16> to vector<8x16xbf16>
    %cst_35 = arith.constant dense<0.000000e+00> : vector<8x16xf32>
    %45 = tpu.matmul %43, %44, %cst_35 {dimension_numbers = #tpu.dot_dimension_numbers<[1], [0], [0], [1], [0, 0, 1, 1], [], []>} : vector<8x8xbf16>, vector<8x16xbf16>, vector<8x16xf32> -> vector<8x16xf32>
    %46 = arith.addf %41, %45 : vector<8x16xf32>
    %c8 = arith.constant 8 : index
    %c0_36 = arith.constant 0 : index
    %c0_37 = arith.constant 0 : index
    %47 = vector.load %arg5[%c8, %c0_36, %c0_37] : memref<9x8x8xbf16, #tpu.memory_space<vmem>>, vector<1x8x8xbf16>
    %48 = vector.shape_cast %47 : vector<1x8x8xbf16> to vector<8x8xbf16>
    %49 = vector.extract_strided_slice %5 {offsets = [0, 2], sizes = [8, 16], strides = [1, 1]} : vector<8x18xbf16> to vector<8x16xbf16>
    %cst_38 = arith.constant dense<0.000000e+00> : vector<8x16xf32>
    %50 = tpu.matmul %48, %49, %cst_38 {dimension_numbers = #tpu.dot_dimension_numbers<[1], [0], [0], [1], [0, 0, 1, 1], [], []>} : vector<8x8xbf16>, vector<8x16xbf16>, vector<8x16xf32> -> vector<8x16xf32>
    %51 = arith.addf %46, %50 : vector<8x16xf32>
    %c0_39 = arith.constant 0 : index
    %c0_40 = arith.constant 0 : index
    %52 = vector.load %arg6[%c0_39, %c0_40] : memref<8x1xf32, #tpu.memory_space<vmem>>, vector<8x1xf32>
    %53 = vector.broadcast %52 : vector<8x1xf32> to vector<8x16xf32>
    %54 = arith.addf %51, %53 : vector<8x16xf32>
    %55 = vector.extract_strided_slice %3 {offsets = [0, 1], sizes = [8, 16], strides = [1, 1]} : vector<8x18xbf16> to vector<8x16xbf16>
    %56 = arith.extf %55 : vector<8x16xbf16> to vector<8x16xf32>
    %57 = arith.addf %54, %56 : vector<8x16xf32>
    %cst_41 = arith.constant 0.000000e+00 : f32
    %58 = vector.broadcast %cst_41 : f32 to vector<8x16xf32>
    %59 = arith.maximumf %57, %58 : vector<8x16xf32>
    %c0_42 = arith.constant 0 : index
    %c0_43 = arith.constant 0 : index
    %60 = vector.load %arg7[%c0_42, %c0_43] : memref<8x8xbf16, #tpu.memory_space<vmem>>, vector<8x8xbf16>
    %61 = arith.truncf %59 : vector<8x16xf32> to vector<8x16xbf16>
    %cst_44 = arith.constant dense<0.000000e+00> : vector<8x16xf32>
    %62 = tpu.matmul %60, %61, %cst_44 {dimension_numbers = #tpu.dot_dimension_numbers<[1], [0], [0], [1], [0, 0, 1, 1], [], []>} : vector<8x8xbf16>, vector<8x16xbf16>, vector<8x16xf32> -> vector<8x16xf32>
    %c0_45 = arith.constant 0 : index
    %c0_46 = arith.constant 0 : index
    %63 = vector.load %arg8[%c0_45, %c0_46] : memref<8x1xf32, #tpu.memory_space<vmem>>, vector<8x1xf32>
    %64 = vector.broadcast %63 : vector<8x1xf32> to vector<8x16xf32>
    %65 = arith.addf %62, %64 : vector<8x16xf32>
    %c0_47 = arith.constant 0 : index
    %c0_48 = arith.constant 0 : index
    %c0_49 = arith.constant 0 : index
    %c0_50 = arith.constant 0 : index
    %66 = vector.load %arg9[%c0_47, %c0_48, %c0_49, %c0_50] : memref<1x1x8x16xf32, #tpu.memory_space<vmem>>, vector<1x1x8x16xf32>
    %67 = vector.shape_cast %66 : vector<1x1x8x16xf32> to vector<8x16xf32>
    %68 = vector.shape_cast %65 : vector<8x16xf32> to vector<1x1x8x16xf32>
    tpu.vector_store %arg9[%c0_47, %c0_48, %c0_49, %c0_50], %68 {strides = array<i32>} : memref<1x1x8x16xf32, #tpu.memory_space<vmem>>, vector<1x1x8x16xf32>,
    return
  }
  func.func @transform_0(%arg0: i32, %arg1: i32) -> (i32, i32, i32, i32) {
    %c0_i32 = arith.constant 0 : i32
    %0 = arith.addi %arg1, %c0_i32 : i32
    %c0_i32_0 = arith.constant 0 : i32
    %c0_i32_1 = arith.constant 0 : i32
    %c0_i32_2 = arith.constant 0 : i32
    return %arg0, %0, %c0_i32_0, %c0_i32_1 : i32, i32, i32, i32
  }
  func.func @transform_1(%arg0: i32, %arg1: i32) -> (i32, i32, i32, i32) {
    %c1_i32 = arith.constant 1 : i32
    %0 = arith.addi %arg1, %c1_i32 : i32
    %c0_i32 = arith.constant 0 : i32
    %c0_i32_0 = arith.constant 0 : i32
    %c0_i32_1 = arith.constant 0 : i32
    return %arg0, %0, %c0_i32, %c0_i32_0 : i32, i32, i32, i32
  }
  func.func @transform_2(%arg0: i32, %arg1: i32) -> (i32, i32, i32, i32) {
    %c2_i32 = arith.constant 2 : i32
    %0 = arith.addi %arg1, %c2_i32 : i32
    %c0_i32 = arith.constant 0 : i32
    %c0_i32_0 = arith.constant 0 : i32
    %c0_i32_1 = arith.constant 0 : i32
    return %arg0, %0, %c0_i32, %c0_i32_0 : i32, i32, i32, i32
  }
  func.func @transform_3(%arg0: i32, %arg1: i32) -> (i32, i32, i32) {
    %c0_i32 = arith.constant 0 : i32
    %c0_i32_0 = arith.constant 0 : i32
    %c0_i32_1 = arith.constant 0 : i32
    %c0_i32_2 = arith.constant 0 : i32
    return %c0_i32, %c0_i32_0, %c0_i32_1 : i32, i32, i32
  }
  func.func @transform_4(%arg0: i32, %arg1: i32) -> (i32, i32) {
    %c0_i32 = arith.constant 0 : i32
    %c0_i32_0 = arith.constant 0 : i32
    %c0_i32_1 = arith.constant 0 : i32
    return %c0_i32, %c0_i32_0 : i32, i32
  }
  func.func @transform_5(%arg0: i32, %arg1: i32) -> (i32, i32) {
    %c0_i32 = arith.constant 0 : i32
    %c0_i32_0 = arith.constant 0 : i32
    %c0_i32_1 = arith.constant 0 : i32
    return %c0_i32, %c0_i32_0 : i32, i32
  }
  func.func @transform_6(%arg0: i32, %arg1: i32) -> (i32, i32) {
    %c0_i32 = arith.constant 0 : i32
    %c0_i32_0 = arith.constant 0 : i32
    %c0_i32_1 = arith.constant 0 : i32
    return %c0_i32, %c0_i32_0 : i32, i32
  }
  func.func @transform_7(%arg0: i32, %arg1: i32) -> (i32, i32, i32, i32) {
    %c0_i32 = arith.constant 0 : i32
    %c0_i32_0 = arith.constant 0 : i32
    %c0_i32_1 = arith.constant 0 : i32
    return %arg0, %arg1, %c0_i32, %c0_i32_0 : i32, i32, i32, i32
  }
}

</mosaic_0001>

<bundles_post_ra>
// kernel: _lambda_.2
= control target key start
LH: loop header
LB: loop body
LE: loop exit
PB: predicated region body
PF: predicated region fallthrough
CT: control target
= control target key end

     0   :  { %s843_s18 = smov 0   ;;  %s845_s19 = smov 0   ;;  %s960_s0 = inlined_call_operand.vmem [shape: bf16[2,18,4,18], index: 0, kind: input, shape index: {}, may-alias: {0,1,2}]   ;;  %s961_s1 = inlined_call_operand.vmem [shape: bf16[2,18,4,18], index: 1, kind: input, shape index: {}, may-alias: {0,1,2}]   ;;  %s962_s2 = inlined_call_operand.vmem [shape: bf16[2,18,4,18], index: 2, kind: input, shape index: {}, may-alias: {0,1,2}]   ;;  %s963_s3 = inlined_call_operand.vmem [shape: bf16[9,8,4], index: 3, kind: input, shape index: {}]   ;;  %s964_s4 = inlined_call_operand.vmem [shape: f32[8,1], index: 4, kind: input, shape index: {}]   ;;  %s965_s5 = inlined_call_operand.vmem [shape: bf16[2,16,8,16], index: 5, kind: output, shape index: {}]  }
   0x1   :  { %s847_s20 = smov 0   ;;  %s849_s21 = smov 0  }
   0x2   :  { %s851_s22 = smov 0  }
   0x3 LB: > { %s24_s23 = sadd.s32 1, %s800_s20  ;;  %s27_s24 = sadd.s32 1, %s804_s21  ;;  %s808_s22 = sphi %s851_s22, %s15_s22   ;;  %s804_s21 = sphi %s849_s21, %s969_s21   ;;  %s800_s20 = sphi %s847_s20, %s968_s20   ;;  %s796_s19 = sphi %s845_s19, %s967_s19   ;;  %s792_s18 = sphi %s843_s18, %s966_s18  }
   0x4   : > { %p25_p0 = scmp.ge.s32.totalorder %s24_s23, 16  ;;  %p700_p1 = scmp.ge.s32.totalorder %s808_s22, 1 }
   0x5   : > { %p244_p2 = scmp.lt.s32.totalorder %s808_s22, 33 }
   0x6   : > { %s971_s23 = smov (%p25_p0, %s24_s23), 0  ;;  %s973_s24 = smov (!%p25_p0, %s27_s24), %s804_s21 }
   0x7   : > { %p245_p3 = pnand %p700_p1, %p244_p2  ;;  %p29_p4 = scmp.ge.s32.totalorder %s973_s24, 2 }
   0x8   : > { %p296_p5 = scmp.lt.s32.totalorder (!%p245_p3), %s796_s19, 1  ;;  %p298_p6 = scmp.lt.s32.totalorder (!%p245_p3), %s792_s18, 17 }
   0x9   : > { %s975_s24 = smov (%p29_p4, %s973_s24), 0  ;;  %248 = sbr.rel (%p245_p3) target bundleno = 324 (0x144), region = 40 }
   0xa   : > { %s304_s25 = sadd.s32 (!%p245_p3), 1, %s792_s18  ;;  %s810_s10 = smov (!%p245_p3), 127  }
   0xb   : > { %p307_p7 = scmp.lt.s32.totalorder (!%p245_p3), %s304_s25, 17  ;;  %s314_s11 = sadd.s32 (!%p245_p3), 2, %s792_s18 }
   0xc   : > { %p317_p8 = scmp.lt.s32.totalorder (!%p245_p3), %s314_s11, 17  ;;  %s811_s15 = smov (!%p245_p3), 126  }
   0xd   : > { %p326_p9 = scmp.lt.s32.totalorder (!%p245_p3), %s792_s18, 15 }
   0xe   : > { %s977_s19 = smov (!%p296_p5, %s796_s19), 1  ;;  %s979_s25 = smov (!%p307_p7, %s304_s25), 17  ;;  %vm349_vm0 = vcmask 1041408   ;;  %vm345_vm1 = vcmask 31744   ;;  %v336_v10 = vld [vmem:[%s963_s3] sm:$0xf] }
   0xf   : > { %s299_s26 = scalar_select %p298_p6, %s792_s18, 17  ;;  %v711_v12 = vld [vmem:[%s963_s3 + $0xc] sm:$0xf]  ;;  %v706_v17 = vld [vmem:[%s963_s3 + $0x4] sm:$0xf]  ;;  %v812_v20 = vmov 0  }
  0x10   : > { %s725_s27 = smul.u32 18, %s977_s19  ;;  %s981_s11 = smov (!%p317_p8, %s314_s11), 17  ;;  %v715_v18 = vld [vmem:[%s963_s3 + $0x14] sm:$0xf]  ;;  %v563_v19 = vld [vmem:[%s964_s4] sm:$0xff]  ;;  %769 = vset.pattern.permute.xlu0 %v812_v20  ;;  %vm572_vm2 = vcmask 125952  }
  0x11   : > { %v709_v24 = vld [vmem:[%s963_s3 + $0x8] sm:$0xf]  ;;  %v713_v29 = vld [vmem:[%s963_s3 + $0x10] sm:$0xf]  ;;  %v717_v30 = vld [vmem:[%s963_s3 + $0x18] sm:$0xf] }
  0x12   : > { %s301_s28 = sadd.s32 %s725_s27, %s299_s26  ;;  %s310_s8 = sadd.s32 %s725_s27, %s979_s25  ;;  %v719_v33 = vld [vmem:[%s963_s3 + $0x1c] sm:$0xf]  ;;  %v721_v34 = vld [vmem:[%s963_s3 + $0x20] sm:$0xf] }
  0x13   : > { %s701_s29 = sshll.u32 %s301_s28, 1  ;;  %s702_s9 = sshll.u32 %s310_s8, 1 }
  0x14   : > { %s303_s7 = scalar_lea.vmem %s960_s0, %s701_s29  ;;  %s312_s14 = scalar_lea.vmem %s961_s1, %s702_s9 }
  0x15   : > { %v333_v0 = vld [vmem:[%s303_s7] sm:$0x3]  ;;  %s320_s16 = sadd.s32 %s725_s27, %s981_s11  ;;  %s983_s18 = smov (!%p326_p9, %s792_s18), 15 }
  0x16   : > { %340 = vst [vmem:[#allocation1] ss:$4 sm:$0xff] %v333_v0  ;;  %v334_v2 = vld [vmem:[%s312_s14] sm:$0x3]  ;;  %s703_s17 = sshll.u32 %s320_s16, 1  ;;  %v369_v9 = vsel %vm349_vm0, %v333_v0, 0 }
  0x17   : > { %s322_s28 = scalar_lea.vmem %s962_s2, %s703_s17  ;;  %378 = vmatpush.bf16.msra.mxu1 %v369_v9  ;;  %v417_v11 = vsel %vm349_vm0, %v334_v2, 0  ;;  %s704_s30 = sshll.u32 %s977_s19, 4 }
  0x18   : > { %v335_v5 = vld [vmem:[%s322_s28] sm:$0x3]  ;;  %426 = vmatpush.bf16.msra.mxu3 %v417_v11  ;;  %s329_s6 = sadd.s32 %s704_s30, %s983_s18 }
  0x19   : > { %v493_v22 = vsel %vm349_vm0, %v335_v5, 0  ;;  %s705_s7 = sshll.u32 %s329_s6, 2 }
  0x1a   : > { %708 = vmatmul.msk.bf16.vlgmr.msra.gmra.mxu1 %vm345_vm1, %v336_v10 }
  0x1b   : > { %712 = vmatmul.msk.bf16.vlgmr.msra.gmra.mxu3 %vm345_vm1, %v711_v12 }
  0x1d   : > { %v341_v1 = vld.sshfl [vmem:[#allocation1] sm:$0xff pattern:$0x73625140] }
  0x1e   : > { %343 = vrot.lane.b32.xlu0 %v341_v1, %s810_s10  ;;  %386 = vst [vmem:[#allocation1] ss:$4 sm:$0xff] %v333_v0 }
  0x25   : > { %v387_v3 = vld.sshfl [vmem:[#allocation1] sm:$0xff pattern:$0x73625140] }
  0x26   : > { %389 = vrot.lane.b32.xlu0 %v387_v3, %s811_s15  ;;  %435 = vst [vmem:[#allocation1] ss:$4 sm:$0xff] %v334_v2 }
  0x2d   : > { %v436_v4 = vld.sshfl [vmem:[#allocation1] sm:$0xff pattern:$0x73625140] }
  0x2e   : > { %438 = vrot.lane.b32.xlu1 %v436_v4, %s810_s10  ;;  %462 = vst [vmem:[#allocation1] ss:$4 sm:$0xff] %v334_v2  ;;  %566 = vperm.xlu0 %769, %v563_v19  }
  0x35   : > { %v463_v6 = vld.sshfl [vmem:[#allocation1] sm:$0xff pattern:$0x73625140] }
  0x36   : > { %511 = vst [vmem:[#allocation1] ss:$4 sm:$0xff] %v335_v5  ;;  %465 = vrot.lane.b32.xlu2 %v463_v6, %s811_s15 }
  0x3d   : > { %v512_v7 = vld.sshfl [vmem:[#allocation1] sm:$0xff pattern:$0x73625140] }
  0x3e   : > { %514 = vrot.lane.b32.xlu1 %v512_v7, %s810_s10  ;;  %538 = vst [vmem:[#allocation1] ss:$4 sm:$0xff] %v335_v5  ;;  %s331_s10 = scalar_lea.vmem %s965_s5, %s705_s7 }
  0x45   : > { %v539_v8 = vld.sshfl [vmem:[#allocation1] sm:$0xff pattern:$0x73625140] }
  0x46   : > { %541 = vrot.lane.b32.xlu2 %v539_v8, %s811_s15 }
  0x90   : > { %v344_v13 = vpop.permute.xlu0 %343  ;;  %v466_v14 = vpop.permute.xlu2 %465 }
  0x91   : > { %v351_v15 = vsel %vm349_vm0, %v344_v13, 0  ;;  %v471_v16 = vsel %vm349_vm0, %v466_v14, 0 }
  0x92   : > { %360 = vmatpush.bf16.msra.mxu0 %v351_v15  ;;  %480 = vmatpush.bf16.msrb.mxu1 %v471_v16 }
  0x95   : > { %707 = vmatmul.msk.bf16.vlgmr.msra.gmra.mxu0 %vm345_vm1, %v706_v17  ;;  %716 = vmatmul.msk.bf16.vlgmr.msrb.gmra.mxu1 %vm345_vm1, %v715_v18 }
  0x97   : > { %v380_v35 = vpop.f32.mrf.mxu1 }
  0x98   : > { %v390_v21 = vpop.permute.xlu0 %389 }
  0x99   : > { %v395_v23 = vsel %vm349_vm0, %v390_v21, 0 }
  0x9a   : > { %404 = vmatpush.bf16.msra.mxu2 %v395_v23 }
  0x9d   : > { %710 = vmatmul.msk.bf16.vlgmr.msra.gmra.mxu2 %vm345_vm1, %v709_v24 }
  0x9e   : > { %502 = vmatpush.bf16.msrb.mxu2 %v493_v22  ;;  %v428_v37 = vpop.f32.mrf.mxu3 }
  0x9f   : > { %v382_v36 = vpop.f32.mrf.mxu1 }
  0xa0   : > { %v439_v25 = vpop.permute.xlu1 %438  ;;  %v542_v26 = vpop.permute.xlu2 %541 }
  0xa1   : > { %v444_v27 = vsel %vm349_vm0, %v439_v25, 0  ;;  %v547_v28 = vsel %vm349_vm0, %v542_v26, 0  ;;  %v567_v58 = vpop.permute.xlu0 %566 }
  0xa2   : > { %453 = vmatpush.bf16.msrb.mxu0 %v444_v27 }
  0xa5   : > { %714 = vmatmul.msk.bf16.vlgmr.msrb.gmra.mxu0 %vm345_vm1, %v713_v29 }
  0xa6   : > { %556 = vmatpush.bf16.msra.mxu0 %v547_v28  ;;  %v430_v38 = vpop.f32.mrf.mxu3 }
  0xad   : > { %718 = vmatmul.msk.bf16.vlgmr.msrb.gmra.mxu2 %vm345_vm1, %v717_v30 }
  0xb0   : > { %v515_v31 = vpop.permute.xlu1 %514 }
  0xb1   : > { %v520_v32 = vsel %vm349_vm0, %v515_v31, 0 }
  0xb2   : > { %529 = vmatpush.bf16.msrb.mxu3 %v520_v32 }
  0xb5   : > { %720 = vmatmul.msk.bf16.vlgmr.msrb.gmra.mxu3 %vm345_vm1, %v719_v33  ;;  %722 = vmatmul.msk.bf16.vlgmr.msra.gmra.mxu0 %vm345_vm1, %v721_v34 }
 0x112   : > { %v362_v39 = vpop.f32.mrf.mxu0  ;;  %v482_v40 = vpop.f32.mrf.mxu1 }
 0x113   : > { %v381_v45 = vadd.f32 %v380_v35, %v362_v39 }
 0x11a   : > { %v364_v41 = vpop.f32.mrf.mxu0  ;;  %v484_v42 = vpop.f32.mrf.mxu1 }
 0x120   : > { %v406_v43 = vpop.f32.mrf.mxu2 }
 0x121   : > { %v410_v47 = vadd.f32 %v406_v43, %v381_v45 }
 0x122   : > { %v455_v44 = vpop.f32.mrf.mxu0 }
 0x123   : > { %v432_v49 = vadd.f32 %v428_v37, %v410_v47 }
 0x125   : > { %v459_v51 = vadd.f32 %v455_v44, %v432_v49 }
 0x127   : > { %v486_v53 = vadd.f32 %v482_v40, %v459_v51 }
 0x128   : > { %v408_v46 = vpop.f32.mrf.mxu2 }
 0x12a   : > { %v457_v48 = vpop.f32.mrf.mxu0 }
 0x130   : > { %v504_v50 = vpop.f32.mrf.mxu2 }
 0x131   : > { %v508_v54 = vadd.f32 %v504_v50, %v486_v53 }
 0x132   : > { %v558_v52 = vpop.f32.mrf.mxu0 }
 0x138   : > { %v531_v55 = vpop.f32.mrf.mxu3  ;;  %v506_v56 = vpop.f32.mrf.mxu2 }
 0x139   : > { %v535_v57 = vadd.f32 %v531_v55, %v508_v54 }
 0x13a   : > { %v560_v59 = vpop.f32.mrf.mxu0 }
 0x13b   : > { %v562_v60 = vadd.f32 %v558_v52, %v535_v57 }
 0x13d   : > { %v569_v61 = vadd.f32 %v567_v58, %v562_v60 }
 0x13f   : > { %v570_v62 = vmax.f32 %v569_v61, 0.0 }
 0x140   : > { %v533_v63 = vpop.f32.mrf.mxu3 }
 0x141   : > { %v571_v0 = vpack.c.bf16 %v570_v62, %v570_v62 }
 0x143   : > { %573 = vst.msk [vmem:[%s331_s10] sm:$0xf] %vm572_vm2, %v571_v0 }
 0x144 PF: > { %s15_s22 = sadd.s32 1, %s808_s22   ;;  %s966_s18 = smov %s800_s20 }
 0x145   : > { %p12_p10 = scmp.ge.s32.totalorder %s15_s22, 34   ;;  %s967_s19 = smov %s804_s21 }
 0x146   : > { %s968_s20 = smov %s971_s23  ;;  %s969_s21 = smov %s975_s24 }
 0x147   :  { %14 = sbr.rel (!%p12_p10) target bundleno = 3 (0x3), region = 84 }

// kernel: _lambda_.3
= control target key start
LH: loop header
LB: loop body
LE: loop exit
PB: predicated region body
PF: predicated region fallthrough
CT: control target
= control target key end

     0   :  { %s932_s24 = smov 0   ;;  %s934_s25 = smov 0   ;;  %s1061_s0 = inlined_call_operand.vmem [shape: bf16[2,18,8,18], index: 0, kind: input, shape index: {}, may-alias: {0,1,2}]   ;;  %s1062_s1 = inlined_call_operand.vmem [shape: bf16[2,18,8,18], index: 1, kind: input, shape index: {}, may-alias: {0,1,2}]   ;;  %s1063_s2 = inlined_call_operand.vmem [shape: bf16[2,18,8,18], index: 2, kind: input, shape index: {}, may-alias: {0,1,2}]   ;;  %s1064_s3 = inlined_call_operand.vmem [shape: bf16[9,8,8], index: 3, kind: input, shape index: {}]   ;;  %s1065_s4 = inlined_call_operand.vmem [shape: f32[8,1], index: 4, kind: input, shape index: {}]   ;;  %s1066_s5 = inlined_call_operand.vmem [shape: bf16[8,8], index: 5, kind: input, shape index: {}]   ;;  %s1067_s6 = inlined_call_operand.vmem [shape: f32[8,1], index: 6, kind: input, shape index: {}]   ;;  %s1068_s7 = inlined_call_operand.vmem [shape: f32[2,16,8,16], index: 7, kind: output, shape index: {}]  }
   0x1   :  { %s936_s26 = smov 0   ;;  %s938_s27 = smov 0  }
   0x2   :  { %s940_s28 = smov 0  }
   0x3 LB: > { %s26_s29 = sadd.s32 1, %s879_s26  ;;  %s29_s30 = sadd.s32 1, %s883_s27  ;;  %s887_s28 = sphi %s940_s28, %s17_s28   ;;  %s883_s27 = sphi %s938_s27, %s1072_s27   ;;  %s879_s26 = sphi %s936_s26, %s1071_s26   ;;  %s875_s25 = sphi %s934_s25, %s1070_s25   ;;  %s871_s24 = sphi %s932_s24, %s1069_s24  }
   0x4   : > { %p27_p0 = scmp.ge.s32.totalorder %s26_s29, 16  ;;  %p777_p1 = scmp.ge.s32.totalorder %s887_s28, 1 }
   0x5   : > { %p294_p2 = scmp.lt.s32.totalorder %s887_s28, 33 }
   0x6   : > { %s1074_s29 = smov (%p27_p0, %s26_s29), 0  ;;  %s1076_s30 = smov (!%p27_p0, %s29_s30), %s883_s27 }
   0x7   : > { %p295_p3 = pnand %p777_p1, %p294_p2  ;;  %p31_p4 = scmp.ge.s32.totalorder %s1076_s30, 2 }
   0x8   : > { %p350_p5 = scmp.lt.s32.totalorder (!%p295_p3), %s875_s25, 1  ;;  %p352_p6 = scmp.lt.s32.totalorder (!%p295_p3), %s871_s24, 17 }
   0x9   : > { %s1078_s30 = smov (%p31_p4, %s1076_s30), 0  ;;  %298 = sbr.rel (%p295_p3) target bundleno = 453 (0x1c5), region = 48 }
   0xa   : > { %s358_s10 = sadd.s32 (!%p295_p3), 1, %s871_s24  ;;  %s368_s11 = sadd.s32 (!%p295_p3), 2, %s871_s24 }
   0xb   : > { %p361_p7 = scmp.lt.s32.totalorder (!%p295_p3), %s358_s10, 17  ;;  %p371_p8 = scmp.lt.s32.totalorder (!%p295_p3), %s368_s11, 17 }
   0xc   : > { %p380_p9 = scmp.lt.s32.totalorder (!%p295_p3), %s871_s24, 15 }
   0xe   : > { %s1080_s25 = smov (!%p350_p5, %s875_s25), 1  ;;  %s1082_s10 = smov (!%p361_p7, %s358_s10), 17  ;;  %vm402_vm0 = vcmask 1043456   ;;  %vm398_vm1 = vcmask 64512   ;;  %v390_v11 = vld [vmem:[%s1064_s3] sm:$0xf] }
   0xf   : > { %s353_s8 = scalar_select %p352_p6, %s871_s24, 17  ;;  %v788_v12 = vld [vmem:[%s1064_s3 + $0xc] sm:$0xf]  ;;  %v792_v15 = vld [vmem:[%s1064_s3 + $0x14] sm:$0xf]  ;;  %v608_v22 = vld [vmem:[%s1065_s4] sm:$0xff] }
  0x10   : > { %s803_s9 = smul.u32 18, %s1080_s25  ;;  %s1084_s11 = smov (!%p371_p8, %s368_s11), 17  ;;  %v783_v18 = vld [vmem:[%s1064_s3 + $0x4] sm:$0xf]  ;;  %v891_v25 = vmov 0   ;;  %vm649_vm2 = vcmask 130048  }
  0x11   : > { %847 = vset.pattern.permute.xlu0 %v891_v25  ;;  %848 = vset.pattern.permute.xlu2 %v891_v25  ;;  %v786_v29 = vld [vmem:[%s1064_s3 + $0x8] sm:$0xf]  ;;  %v796_v32 = vld [vmem:[%s1064_s3 + $0x1c] sm:$0xf]  ;;  %v790_v33 = vld [vmem:[%s1064_s3 + $0x10] sm:$0xf] }
  0x12   : > { %s355_s12 = sadd.s32 %s803_s9, %s353_s8  ;;  %s364_s17 = sadd.s32 %s803_s9, %s1082_s10  ;;  %v794_v34 = vld [vmem:[%s1064_s3 + $0x18] sm:$0xf]  ;;  %v798_v35 = vld [vmem:[%s1064_s3 + $0x20] sm:$0xf] }
  0x13   : > { %s778_s13 = sshll.u32 %s355_s12, 2  ;;  %s779_s18 = sshll.u32 %s364_s17, 2  ;;  %v624_v48 = vld [vmem:[%s1067_s6] sm:$0xff] }
  0x14   : > { %s357_s16 = scalar_lea.vmem %s1061_s0, %s778_s13  ;;  %s374_s19 = sadd.s32 %s803_s9, %s1084_s11 }
  0x15   : > { %v387_v0 = vld [vmem:[%s357_s16] sm:$0xf]  ;;  %s366_s22 = scalar_lea.vmem %s1062_s1, %s779_s18  ;;  %s780_s23 = sshll.u32 %s374_s19, 2 }
  0x16   : > { %v394_v1 = vunpack.c.l.b16 %v387_v0  ;;  %s889_s8 = smov 127   ;;  %v388_v3 = vld [vmem:[%s366_s22] sm:$0xf]  ;;  %s376_s13 = scalar_lea.vmem %s1063_s2, %s780_s23  ;;  %v423_v9 = vsel %vm402_vm0, %v387_v0, 0 }
  0x17   : > { %v487_v4 = vunpack.c.l.b16 %v388_v3  ;;  %v389_v5 = vld [vmem:[%s376_s13] sm:$0xf]  ;;  %s890_s9 = smov 126   ;;  %v468_v10 = vsel %vm402_vm0, %v388_v3, 0  ;;  %432 = vmatpush.bf16.msra.mxu1 %v423_v9  ;;  %v615_v23 = vunpack.c.l.bf16 %v388_v3  ;;  %s1086_s24 = smov (!%p380_p9, %s871_s24), 15 }
  0x18   : > { %v395_v2 = vpack.c.b16 %v394_v1, %v394_v1  ;;  %v560_v7 = vunpack.c.l.b16 %v389_v5  ;;  %477 = vmatpush.bf16.msra.mxu3 %v468_v10  ;;  %v541_v27 = vsel %vm402_vm0, %v389_v5, 0  ;;  %s781_s21 = sshll.u32 %s1080_s25, 4 }
  0x19   : > { %v488_v6 = vpack.c.b16 %v487_v4, %v487_v4  ;;  %s383_s22 = sadd.s32 %s781_s21, %s1086_s24 }
  0x1a   : > { %396 = vrot.lane.b32.xlu0 %v395_v2, %s889_s8  ;;  %v561_v8 = vpack.c.b16 %v560_v7, %v560_v7  ;;  %785 = vmatmul.msk.bf16.vlgmr.msra.gmra.mxu1 %vm398_vm1, %v390_v11  ;;  %s782_s23 = sshll.u32 %s383_s22, 3 }
  0x1b   : > { %489 = vrot.lane.b32.xlu1 %v488_v6, %s889_s8  ;;  %513 = vrot.lane.b32.xlu2 %v488_v6, %s890_s9  ;;  %v622_v6 = vld [vmem:[%s1066_s5] sm:$0xf]  ;;  %s385_s13 = scalar_lea.vmem %s1068_s7, %s782_s23 }
  0x1c   : > { %789 = vmatmul.msk.bf16.vlgmr.msra.gmra.mxu3 %vm398_vm1, %v788_v12 }
  0x22   : > { %440 = vrot.lane.b32.xlu0 %v395_v2, %s890_s9 }
  0x23   : > { %562 = vrot.lane.b32.xlu1 %v561_v8, %s889_s8  ;;  %586 = vrot.lane.b32.xlu2 %v561_v8, %s890_s9 }
  0x2a   : > { %611 = vperm.xlu0 %847, %v608_v22  }
  0x2b   : > { %617 = vrot.lane.b32.xlu1 %v615_v23, %s889_s8  ;;  %627 = vperm.xlu2 %848, %v624_v48  }
  0x75   : > { %v514_v13 = vpop.permute.xlu2 %513 }
  0x76   : > { %v519_v14 = vsel %vm402_vm0, %v514_v13, 0 }
  0x77   : > { %528 = vmatpush.bf16.msrb.mxu1 %v519_v14 }
  0x7a   : > { %793 = vmatmul.msk.bf16.vlgmr.msrb.gmra.mxu1 %vm398_vm1, %v792_v15 }
  0x7d   : > { %v587_v19 = vpop.permute.xlu2 %586 }
  0x7e   : > { %v592_v21 = vsel %vm402_vm0, %v587_v19, 0 }
  0x85   : > { %v628_v7 = vpop.permute.xlu2 %627 }
  0x8c   : > { %v397_v16 = vpop.permute.xlu0 %396 }
  0x8d   : > { %v404_v17 = vsel %vm402_vm0, %v397_v16, 0  ;;  %v490_v20 = vpop.permute.xlu1 %489 }
  0x8e   : > { %413 = vmatpush.bf16.msra.mxu0 %v404_v17  ;;  %v495_v24 = vsel %vm402_vm0, %v490_v20, 0 }
  0x91   : > { %784 = vmatmul.msk.bf16.vlgmr.msra.gmra.mxu0 %vm398_vm1, %v783_v18 }
  0x92   : > { %504 = vmatpush.bf16.msrb.mxu0 %v495_v24 }
  0x94   : > { %v441_v26 = vpop.permute.xlu0 %440 }
  0x95   : > { %v446_v28 = vsel %vm402_vm0, %v441_v26, 0  ;;  %v563_v30 = vpop.permute.xlu1 %562 }
  0x96   : > { %601 = vmatpush.bf16.msra.mxu0 %v592_v21  ;;  %455 = vmatpush.bf16.msra.mxu2 %v446_v28  ;;  %v568_v31 = vsel %vm402_vm0, %v563_v30, 0 }
  0x97   : > { %577 = vmatpush.bf16.msrb.mxu3 %v568_v31  ;;  %v434_v36 = vpop.f32.mrf.mxu1 }
  0x99   : > { %787 = vmatmul.msk.bf16.vlgmr.msra.gmra.mxu2 %vm398_vm1, %v786_v29 }
  0x9a   : > { %550 = vmatpush.bf16.msrb.mxu2 %v541_v27  ;;  %797 = vmatmul.msk.bf16.vlgmr.msrb.gmra.mxu3 %vm398_vm1, %v796_v32 }
  0x9c   : > { %v612_v60 = vpop.permute.xlu0 %611 }
  0x9d   : > { %v618_v62 = vpop.permute.xlu1 %617 }
  0x9f   : > { %v479_v37 = vpop.f32.mrf.mxu3  ;;  %v436_v38 = vpop.f32.mrf.mxu1 }
  0xa1   : > { %791 = vmatmul.msk.bf16.vlgmr.msrb.gmra.mxu0 %vm398_vm1, %v790_v33 }
  0xa7   : > { %v481_v39 = vpop.f32.mrf.mxu3 }
  0xa9   : > { %795 = vmatmul.msk.bf16.vlgmr.msrb.gmra.mxu2 %vm398_vm1, %v794_v34 }
  0xb1   : > { %799 = vmatmul.msk.bf16.vlgmr.msra.gmra.mxu0 %vm398_vm1, %v798_v35 }
  0xf7   : > { %v530_v40 = vpop.f32.mrf.mxu1 }
  0xff   : > { %v532_v41 = vpop.f32.mrf.mxu1 }
 0x10e   : > { %v415_v42 = vpop.f32.mrf.mxu0 }
 0x10f   : > { %v435_v45 = vadd.f32 %v434_v36, %v415_v42 }
 0x116   : > { %v417_v43 = vpop.f32.mrf.mxu0 }
 0x11c   : > { %v457_v44 = vpop.f32.mrf.mxu2 }
 0x11d   : > { %v461_v47 = vadd.f32 %v457_v44, %v435_v45  ;;  %v579_v49 = vpop.f32.mrf.mxu3 }
 0x11e   : > { %v506_v46 = vpop.f32.mrf.mxu0 }
 0x11f   : > { %v483_v50 = vadd.f32 %v479_v37, %v461_v47 }
 0x121   : > { %v510_v53 = vadd.f32 %v506_v46, %v483_v50 }
 0x123   : > { %v534_v55 = vadd.f32 %v530_v40, %v510_v53 }
 0x124   : > { %v459_v51 = vpop.f32.mrf.mxu2 }
 0x125   : > { %v581_v54 = vpop.f32.mrf.mxu3 }
 0x126   : > { %v508_v52 = vpop.f32.mrf.mxu0 }
 0x12c   : > { %v552_v56 = vpop.f32.mrf.mxu2 }
 0x12d   : > { %v556_v57 = vadd.f32 %v552_v56, %v534_v55 }
 0x12e   : > { %v603_v58 = vpop.f32.mrf.mxu0 }
 0x12f   : > { %v583_v59 = vadd.f32 %v579_v49, %v556_v57 }
 0x131   : > { %v607_v61 = vadd.f32 %v603_v58, %v583_v59 }
 0x133   : > { %v614_v63 = vadd.f32 %v612_v60, %v607_v61 }
 0x134   : > { %v554_v0 = vpop.f32.mrf.mxu2 }
 0x135   : > { %v620_v1 = vadd.f32 %v618_v62, %v614_v63 }
 0x136   : > { %v605_v2 = vpop.f32.mrf.mxu0 }
 0x137   : > { %v621_v3 = vmax.f32 %v620_v1, 0.0 }
 0x139   : > { %v623_v4 = vpack.c.bf16 %v621_v3, %v621_v3 }
 0x13b   : > { %v634_v5 = vsel %vm402_vm0, %v623_v4, 0 }
 0x13c   : > { %643 = vmatpush.bf16.msra.mxu1 %v634_v5 }
 0x13f   : > { %800 = vmatmul.msk.bf16.vlgmr.msra.gmra.mxu1 %vm398_vm1, %v622_v6 }
 0x1bc   : > { %v645_v8 = vpop.f32.mrf.mxu1 }
 0x1bd   : > { %v646_v9 = vadd.f32 %v645_v8, %v628_v7 }
 0x1bf   : > { %650 = vst.msk [vmem:[%s385_s13] sm:$0xff] %vm649_vm2, %v646_v9 }
 0x1c4   : > { %v647_v10 = vpop.f32.mrf.mxu1 }
 0x1c5 PF: > { %s17_s28 = sadd.s32 1, %s887_s28   ;;  %s1069_s24 = smov %s879_s26 }
 0x1c6   : > { %p14_p10 = scmp.ge.s32.totalorder %s17_s28, 34   ;;  %s1070_s25 = smov %s883_s27 }
 0x1c7   : > { %s1071_s26 = smov %s1074_s29  ;;  %s1072_s27 = smov %s1078_s30 }
 0x1c8   :  { %16 = sbr.rel (!%p14_p10) target bundleno = 3 (0x3), region = 92 }

</bundles_post_ra>
